<compile_context>
chip_gen: v7x
topology: tpu7x:2x2x1
jax: 0.10.0
libtpu: 0.0.40
codegen_flags: <defaults>
</compile_context>

<pallas_src>
import math
import functools
import numpy as np

import jax
import jax.numpy as jnp
from jax.experimental import pallas as pl
from jax.experimental.pallas import tpu as pltpu

VMEM_SPEC = pl.BlockSpec(memory_space=pltpu.MemorySpace.VMEM)
_LN_EPS = 1e-5                       # torch.nn.LayerNorm default
_VMEM_LIMIT = 48 * 1024 * 1024       # fits v5e/v6e (128 MiB) and v7x (64 MiB) physical VMEM


# ----------------------------------------------------------------------------
# Small helpers
# ----------------------------------------------------------------------------

def _row_tile(m):
    """Largest row tile (multiple of 8, <= 512) dividing m; full m for small slabs."""
    if m <= 512:
        return m
    for tm in (512, 256, 128, 64, 32, 16, 8):
        if m % tm == 0:
            return tm
    return m


def _row_spec(tm, cols):
    return pl.BlockSpec((tm, cols), lambda i: (i, 0))


def _const_spec(shape):
    nd = len(shape)
    return pl.BlockSpec(shape, lambda *_: (0,) * nd)


def _gelu(x):
    # GaussianRectifier: 0.5*x*(1+tanh(sqrt(2/pi)*(x+0.044715*x^3)))
    c = math.sqrt(2.0 / math.pi)
    return 0.5 * x * (1.0 + jnp.tanh(c * (x + 0.044715 * x * x * x)))


def _layernorm(y, g, b, eps):
    mu = jnp.mean(y, axis=-1, keepdims=True)
    var = jnp.mean(jnp.square(y - mu), axis=-1, keepdims=True)
    return (y - mu) * jax.lax.rsqrt(var + eps) * g + b


def _mosaic_params():
    return pltpu.CompilerParams(dimension_semantics=("parallel",),
                                vmem_limit_bytes=_VMEM_LIMIT)


# ----------------------------------------------------------------------------
# Pallas kernels
# ----------------------------------------------------------------------------

def _linear_kernel(x_ref, w_ref, b_ref, o_ref):
    o_ref[...] = (jnp.dot(x_ref[...], w_ref[...],
                          preferred_element_type=jnp.float32) + b_ref[...])


def linear_pallas(x2d, w, b):
    """x2d: (M, K), w: (K, N), b: (N,) -> (M, N) f32, row-tiled grid."""
    M, K = x2d.shape
    N = w.shape[1]
    tm = _row_tile(M)
    return pl.pallas_call(
        _linear_kernel,
        out_shape=jax.ShapeDtypeStruct((M, N), jnp.float32),
        grid=(M // tm,),
        in_specs=[_row_spec(tm, K), _const_spec((K, N)), _const_spec((1, N))],
        out_specs=_row_spec(tm, N),
        compiler_params=_mosaic_params(),
    )(x2d.astype(jnp.float32), w.astype(jnp.float32),
      jnp.asarray(b, jnp.float32).reshape(1, N))


def _attn_kernel(q_ref, k_ref, v_ref, m_ref, ctx_ref, attn_ref, *, scale, heads):
    q = q_ref[...]                        # (B*H, Lq, dk)
    k = k_ref[...]                        # (B*H, Lk, dk)
    v = v_ref[...]                        # (B*H, Lk, dv)
    m = m_ref[...]                        # (B, Lq, Lk) int32 (nonzero => masked)
    BH, Lq, _ = q.shape
    Lk = k.shape[1]
    B = BH // heads
    # scores: contract last dims, batch over B*H -> no transpose of k materialized
    s = jax.lax.dot_general(q, k, (((2,), (2,)), ((0,), (0,))),
                            preferred_element_type=jnp.float32) * scale
    mask_bh = jnp.broadcast_to(m[:, None, :, :],
                               (B, heads, Lq, Lk)).reshape(BH, Lq, Lk)
    s = jnp.where(mask_bh != 0, jnp.float32(-1.0e9), s)
    s_max = jnp.max(s, axis=-1, keepdims=True)
    e = jnp.exp(s - s_max)
    p = e / jnp.sum(e, axis=-1, keepdims=True)
    attn_ref[...] = p
    ctx_ref[...] = jax.lax.dot_general(p, v, (((2,), (1,)), ((0,), (0,))),
                                       preferred_element_type=jnp.float32)


def attention_pallas(q, k, v, mask, d_k, heads):
    """Single-shot attention over all (batch*head) slabs; mask is (B, Lq, Lk)."""
    # TODO(synk): for long sequences replace this single-shot kernel with a
    #             flash-style tiled grid (online softmax) to bound VMEM use.
    BH, Lq, dk = q.shape
    Lk = k.shape[1]
    dv = v.shape[2]
    scale = float(1.0 / np.sqrt(d_k))
    ctx, attn = pl.pallas_call(
        functools.partial(_attn_kernel, scale=scale, heads=heads),
        out_shape=(jax.ShapeDtypeStruct((BH, Lq, dv), jnp.float32),
                   jax.ShapeDtypeStruct((BH, Lq, Lk), jnp.float32)),
        in_specs=[VMEM_SPEC, VMEM_SPEC, VMEM_SPEC, VMEM_SPEC],
        out_specs=(VMEM_SPEC, VMEM_SPEC),
    )(q.astype(jnp.float32), k.astype(jnp.float32), v.astype(jnp.float32),
      mask.astype(jnp.int32))
    return ctx, attn


def _proj_add_ln_kernel(x_ref, w_ref, b_ref, r_ref, g_ref, bt_ref,
                        ln_ref, proj_ref, *, eps):
    proj = (jnp.dot(x_ref[...], w_ref[...],
                    preferred_element_type=jnp.float32) + b_ref[...])
    proj_ref[...] = proj
    ln_ref[...] = _layernorm(proj + r_ref[...], g_ref[...], bt_ref[...], eps)


def proj_add_ln_pallas(ctx2d, wo, bo, res2d, lnp):
    """Returns (LayerNorm(ctx@wo + bo + res), ctx@wo + bo) in one fused kernel."""
    M, Kv = ctx2d.shape
    D = wo.shape[1]
    tm = _row_tile(M)
    ln_out, proj = pl.pallas_call(
        functools.partial(_proj_add_ln_kernel, eps=_LN_EPS),
        out_shape=(jax.ShapeDtypeStruct((M, D), jnp.float32),
                   jax.ShapeDtypeStruct((M, D), jnp.float32)),
        grid=(M // tm,),
        in_specs=[_row_spec(tm, Kv), _const_spec((Kv, D)), _const_spec((1, D)),
                  _row_spec(tm, D), _const_spec((1, D)), _const_spec((1, D))],
        out_specs=(_row_spec(tm, D), _row_spec(tm, D)),
        compiler_params=_mosaic_params(),
    )(ctx2d.astype(jnp.float32), wo.astype(jnp.float32),
      bo.astype(jnp.float32).reshape(1, D), res2d.astype(jnp.float32),
      lnp["g"].reshape(1, D), lnp["b"].reshape(1, D))
    return ln_out, proj


def _ffn_add_ln_kernel(x_ref, w1_ref, b1_ref, w2_ref, b2_ref, r_ref,
                       g_ref, bt_ref, o_ref, *, eps):
    h = (jnp.dot(x_ref[...], w1_ref[...],
                 preferred_element_type=jnp.float32) + b1_ref[...])
    h = _gelu(h)
    y = (jnp.dot(h, w2_ref[...], preferred_element_type=jnp.float32)
         + b2_ref[...] + r_ref[...])
    o_ref[...] = _layernorm(y, g_ref[...], bt_ref[...], eps)


def ffn_add_ln_pallas(x2d, ffp, res2d, lnp):
    """LayerNorm(FFN(x) + res) in one fused kernel (l1 + GELU + l2 + add + LN)."""
    M, D = x2d.shape
    F = ffp["w1"].shape[1]
    tm = _row_tile(M)
    return pl.pallas_call(
        functools.partial(_ffn_add_ln_kernel, eps=_LN_EPS),
        out_shape=jax.ShapeDtypeStruct((M, D), jnp.float32),
        grid=(M // tm,),
        in_specs=[_row_spec(tm, D),
                  _const_spec((D, F)), _const_spec((1, F)),
                  _const_spec((F, D)), _const_spec((1, D)),
                  _row_spec(tm, D),
                  _const_spec((1, D)), _const_spec((1, D))],
        out_specs=_row_spec(tm, D),
        compiler_params=_mosaic_params(),
    )(x2d.astype(jnp.float32), ffp["w1"], ffp["b1"].reshape(1, F),
      ffp["w2"], ffp["b2"].reshape(1, D), res2d.astype(jnp.float32),
      lnp["g"].reshape(1, D), lnp["b"].reshape(1, D))


def _proj_softmax_kernel(x_ref, w_ref, o_ref, *, valid_n):
    logits = jnp.dot(x_ref[...], w_ref[...], preferred_element_type=jnp.float32)
    col = jax.lax.broadcasted_iota(jnp.int32, logits.shape, 1)
    logits = jnp.where(col < valid_n, logits, jnp.float32(-1.0e30))
    m = jnp.max(logits, axis=-1, keepdims=True)
    e = jnp.exp(logits - m)
    o_ref[...] = e / jnp.sum(e, axis=-1, keepdims=True)


def proj_softmax_pallas(x2d, w_pad, valid_n):
    """Fused final projection (bias-free) + row softmax; 128-lane padded output."""
    M, D = x2d.shape
    Vp = w_pad.shape[1]
    tm = _row_tile(M)
    probs = pl.pallas_call(
        functools.partial(_proj_softmax_kernel, valid_n=valid_n),
        out_shape=jax.ShapeDtypeStruct((M, Vp), jnp.float32),
        grid=(M // tm,),
        in_specs=[_row_spec(tm, D), _const_spec((D, Vp))],
        out_specs=_row_spec(tm, Vp),
        compiler_params=_mosaic_params(),
    )(x2d.astype(jnp.float32), w_pad)
    return probs[:, :valid_n]


# ----------------------------------------------------------------------------
# Parameter initialization (deterministic, torch-like shapes)
# ----------------------------------------------------------------------------

def init_linear_params(key, d_in, d_out, bias=True):
    k1, k2 = jax.random.split(key)
    bound = 1.0 / math.sqrt(d_in)
    w = jax.random.uniform(k1, (d_in, d_out), jnp.float32, -bound, bound)
    b = (jax.random.uniform(k2, (d_out,), jnp.float32, -bound, bound)
         if bias else None)
    return {"w": w, "b": b}


def init_ln_params(d):
    return {"g": jnp.ones((d,), jnp.float32), "b": jnp.zeros((d,), jnp.float32)}


def init_multihead_params(key, d_model, d_k, d_v, n_heads):
    ks = jax.random.split(key, 4)
    wq = init_linear_params(ks[0], d_model, d_k * n_heads)
    wk = init_linear_params(ks[1], d_model, d_k * n_heads)
    wv = init_linear_params(ks[2], d_model, d_v * n_heads)
    wo = init_linear_params(ks[3], d_v * n_heads, d_model)
    # fuse WQ|WK|WV so one matmul projects all three (or WQ / WK|WV for cross-attn)
    return {"wqkv": jnp.concatenate([wq["w"], wk["w"], wv["w"]], axis=1),
            "bqkv": jnp.concatenate([wq["b"], wk["b"], wv["b"]]),
            "wo": wo["w"], "bo": wo["b"]}


def init_ff_params(key, d_model, d_ff):
    k1, k2 = jax.random.split(key)
    l1 = init_linear_params(k1, d_model, d_ff)
    l2 = init_linear_params(k2, d_ff, d_model)
    return {"w1": l1["w"], "b1": l1["b"], "w2": l2["w"], "b2": l2["b"]}


def init_encoder_layer(key, cfg):
    k1, k2 = jax.random.split(key)
    return {"att": init_multihead_params(k1, cfg["d_model"], cfg["d_k"],
                                         cfg["d_v"], cfg["n_heads"]),
            "ff": init_ff_params(k2, cfg["d_model"], cfg["d_ff"]),
            "ln1": init_ln_params(cfg["d_model"]),
            "ln2": init_ln_params(cfg["d_model"])}


def init_decoder_layer(key, cfg):
    k1, k2, k3 = jax.random.split(key, 3)
    return {"att_dec": init_multihead_params(k1, cfg["d_model"], cfg["d_k"],
                                             cfg["d_v"], cfg["n_heads"]),
            "att_enc_dec": init_multihead_params(k2, cfg["d_model"], cfg["d_k"],
                                                 cfg["d_v"], cfg["n_heads"]),
            "ff": init_ff_params(k3, cfg["d_model"], cfg["d_ff"]),
            "ln1": init_ln_params(cfg["d_model"]),
            "ln2": init_ln_params(cfg["d_model"]),
            "ln3": init_ln_params(cfg["d_model"])}


def positional_encoding(max_len, d_model):
    pos = np.arange(max_len, dtype=np.float32)[:, None]
    div = np.exp(-np.arange(0, d_model, 2, dtype=np.float32)
                 * math.log(10000.0) / d_model)
    enc = np.zeros((max_len, d_model), dtype=np.float32)
    enc[:, 0::2] = np.sin(pos * div)
    enc[:, 1::2] = np.cos(pos * div)
    return jnp.asarray(enc)


def init_seq2seq_params(key, cfg):
    keys = jax.random.split(key, 6)
    enc_layers = [init_encoder_layer(k, cfg)
                  for k in jax.random.split(keys[0], cfg["N"])]
    dec_layers = [init_decoder_layer(k, cfg)
                  for k in jax.random.split(keys[1], cfg["N"])]
    penc = positional_encoding(cfg["max_seq_len"], cfg["d_model"])
    proj_w = init_linear_params(keys[4], cfg["d_model"], cfg["vocab_b"],
                                bias=False)["w"]
    vpad = ((cfg["vocab_b"] + 127) // 128) * 128   # lane-dense final store
    proj_w_pad = jnp.zeros((cfg["d_model"], vpad), jnp.float32)
    proj_w_pad = proj_w_pad.at[:, :cfg["vocab_b"]].set(proj_w)
    return {
        "encoder": {"embed": jax.random.normal(keys[2],
                                               (cfg["vocab_a"], cfg["d_model"]),
                                               jnp.float32),
                    "penc": penc, "layers": enc_layers},
        "decoder": {"embed": jax.random.normal(keys[3],
                                               (cfg["vocab_b"], cfg["d_model"]),
                                               jnp.float32),
                    "penc": penc, "layers": dec_layers},
        "proj_w_pad": proj_w_pad,
    }


# ----------------------------------------------------------------------------
# Forward pass (glue in JAX, compute in fused Pallas kernels)
# ----------------------------------------------------------------------------

def create_pad_mask(query_seq, key_seq, pad_idx):
    B, Lq = query_seq.shape
    Lk = key_seq.shape[1]
    m = (key_seq == pad_idx).astype(jnp.int32)[:, None, :]
    return jnp.broadcast_to(m, (B, Lq, Lk))


def multihead_fwd(p, Q, KV, mask, cfg, self_attn):
    """Returns (context 2-D slab (B*Lq, H*dv), attention (B, H, Lq, Lk))."""
    B, Lq, dm = Q.shape
    Lk = KV.shape[1]
    H, dk, dv = cfg["n_heads"], cfg["d_k"], cfg["d_v"]
    if self_attn:
        qkv = linear_pallas(Q.reshape(B * Lq, dm), p["wqkv"], p["bqkv"])
        q2 = qkv[:, :H * dk]
        k2 = qkv[:, H * dk:2 * H * dk]
        v2 = qkv[:, 2 * H * dk:]
    else:
        q2 = linear_pallas(Q.reshape(B * Lq, dm), p["wqkv"][:, :H * dk],
                           p["bqkv"][:H * dk])
        kv = linear_pallas(KV.reshape(B * Lk, dm), p["wqkv"][:, H * dk:],
                           p["bqkv"][H * dk:])
        k2 = kv[:, :H * dk]
        v2 = kv[:, H * dk:]
    # TODO(synk): head split/merge kept in the JAX wrapper (tiny relayouts here);
    #             fold into the kernel via in-VMEM reshape once shapes grow.
    q = q2.reshape(B, Lq, H, dk).transpose(0, 2, 1, 3).reshape(B * H, Lq, dk)
    k = k2.reshape(B, Lk, H, dk).transpose(0, 2, 1, 3).reshape(B * H, Lk, dk)
    v = v2.reshape(B, Lk, H, dv).transpose(0, 2, 1, 3).reshape(B * H, Lk, dv)
    ctx, attn = attention_pallas(q, k, v, mask, dk, H)
    ctx2 = ctx.reshape(B, H, Lq, dv).transpose(0, 2, 1, 3).reshape(B * Lq, H * dv)
    return ctx2, attn.reshape(B, H, Lq, Lk)


def encoder_layer_fwd(p, x, mask, cfg):
    B, L, D = x.shape
    ctx2d, attn = multihead_fwd(p["att"], x, x, mask, cfg, self_attn=True)
    # norm1(inputs + multihead(inputs))  -- fused Wo + add + LN
    y2d, _ = proj_add_ln_pallas(ctx2d, p["att"]["wo"], p["att"]["bo"],
                                x.reshape(B * L, D), p["ln1"])
    # norm2(encoded + FFN(encoded))      -- fused FFN + add + LN
    out2d = ffn_add_ln_pallas(y2d, p["ff"], y2d, p["ln2"])
    return out2d.reshape(B, L, D), attn


def decoder_layer_fwd(p, x_dec, dec_mask, enc_out, enc_mask, cfg):
    B, L, D = x_dec.shape
    ctx1, attn_dec = multihead_fwd(p["att_dec"], x_dec, x_dec, dec_mask, cfg,
                                   self_attn=True)
    # norm1(out_dec + inputs_dec)
    y2d, _ = proj_add_ln_pallas(ctx1, p["att_dec"]["wo"], p["att_dec"]["bo"],
                                x_dec.reshape(B * L, D), p["ln1"])
    y = y2d.reshape(B, L, D)
    ctx2, attn_ed = multihead_fwd(p["att_enc_dec"], y, enc_out, enc_mask, cfg,
                                  self_attn=False)
    # norm2(out_dec_enc + out_dec); also keep raw out_dec_enc for norm3 residual
    z2d, a2_proj = proj_add_ln_pallas(ctx2, p["att_enc_dec"]["wo"],
                                      p["att_enc_dec"]["bo"], y2d, p["ln2"])
    # matches reference exactly: norm3(out_ff + out_dec_enc)
    out2d = ffn_add_ln_pallas(z2d, p["ff"], a2_proj, p["ln3"])
    return out2d.reshape(B, L, D), attn_dec, attn_ed


def encoder_fwd(p, x_ids, mask, cfg):
    emb = jnp.take(p["embed"], x_ids, axis=0)        # (B, L, dm)
    L = x_ids.shape[1]
    out = emb + p["penc"][None, :L, :]
    attns = []
    for lp in p["layers"]:
        out, a = encoder_layer_fwd(lp, out, mask, cfg)
        attns.append(a)
    attns = jnp.stack(attns).transpose(1, 0, 2, 3, 4)   # (B, N, H, L, L)
    return out, attns


def decoder_fwd(p, dec_in, enc_in, enc_out, dec_mask, pad_idx_b, cfg):
    emb = jnp.take(p["embed"], dec_in, axis=0)
    L = dec_in.shape[1]
    out = emb + p["penc"][None, :L, :]
    # NOTE: matches the PyTorch reference, which tests enc_in against the
    #       decoder's pad index (self.pidx == p_idx_b).
    enc_mask = create_pad_mask(dec_in, enc_in, pad_idx_b)
    dec_attns, enc_attns = [], []
    for lp in p["layers"]:
        out, da, ea = decoder_layer_fwd(lp, out, dec_mask, enc_out,
                                        enc_mask, cfg)
        dec_attns.append(da)
        enc_attns.append(ea)
    dec_attns = jnp.stack(dec_attns).transpose(1, 0, 2, 3, 4)
    enc_attns = jnp.stack(enc_attns).transpose(1, 0, 2, 3, 4)
    return out, dec_attns, enc_attns


def seq2seq_fwd(params, inputs_a, inputs_b, enc_mask, dec_mask, cfg):
    enc_out, enc_attns = encoder_fwd(params["encoder"], inputs_a, enc_mask, cfg)
    dec_out, dec_attns, dec_enc_attns = decoder_fwd(
        params["decoder"], inputs_b, inputs_a, enc_out, dec_mask,
        cfg["p_idx_b"], cfg)
    B, Lb, D = dec_out.shape
    probs = proj_softmax_pallas(dec_out.reshape(B * Lb, D),
                                params["proj_w_pad"], cfg["vocab_b"])
    return (probs.reshape(B, Lb, cfg["vocab_b"]),
            enc_attns, dec_attns, dec_enc_attns)


# ----------------------------------------------------------------------------
# Main
# ----------------------------------------------------------------------------

if __name__ == "__main__":
    cfg = dict(vocab_a=11, vocab_b=13, d_model=32, d_ff=64, n_heads=4,
               d_k=8, d_v=8, N=2, p_idx_a=0, p_idx_b=0, max_seq_len=64)

    key = jax.random.PRNGKey(0)
    kp, ka, kb = jax.random.split(key, 3)
    params = init_seq2seq_params(kp, cfg)

    B, La, Lb = 2, 8, 8
    inputs_a = jax.random.randint(ka, (B, La), 1, cfg["vocab_a"],
                                  dtype=jnp.int32)
    inputs_b = jax.random.randint(kb, (B, Lb), 1, cfg["vocab_b"],
                                  dtype=jnp.int32)
    # pad the tail of each sequence to exercise the pad masks
    inputs_a = inputs_a.at[:, -2:].set(cfg["p_idx_a"])
    inputs_b = inputs_b.at[:, -2:].set(cfg["p_idx_b"])

    enc_mask = create_pad_mask(inputs_a, inputs_a, cfg["p_idx_a"])
    causal = jnp.triu(jnp.ones((Lb, Lb), jnp.int32), k=1)[None, :, :]
    dec_mask = jnp.clip(
        create_pad_mask(inputs_b, inputs_b, cfg["p_idx_b"]) + causal, 0, 1)

    probs, enc_attns, dec_attns, dec_enc_attns = seq2seq_fwd(
        params, inputs_a, inputs_b, enc_mask, dec_mask, cfg)

    jax.block_until_ready((probs, enc_attns, dec_attns, dec_enc_attns))

    assert probs.shape == (B, Lb, cfg["vocab_b"])
    assert enc_attns.shape == (B, cfg["N"], cfg["n_heads"], La, La)
    assert dec_attns.shape == (B, cfg["N"], cfg["n_heads"], Lb, Lb)
    assert dec_enc_attns.shape == (B, cfg["N"], cfg["n_heads"], Lb, La)
    assert bool(jnp.all(jnp.isfinite(probs)))
    # each row of probs must sum to 1 (softmax over real vocab columns only)
    assert bool(jnp.all(jnp.abs(jnp.sum(probs, axis=-1) - 1.0) < 1e-4))

    print("KERNEL_OK")
</pallas_src>

<mosaic_0001>
module attributes {stable_mosaic.version = 11 : i64} {
  func.func @_linear_kernel(%arg0: i32, %arg1: memref<16x32xf32, #tpu.memory_space<vmem>>, %arg2: memref<32x96xf32, #tpu.memory_space<vmem>>, %arg3: memref<1x96xf32, #tpu.memory_space<vmem>>, %arg4: memref<16x96xf32, #tpu.memory_space<vmem>>) attributes {dimension_semantics = [#tpu.dimension_semantics<parallel>], iteration_bounds = array<i64: 1>, scalar_prefetch = 0 : i64, scratch_operands = 0 : i64, tpu.core_type = #tpu.core_type<tc>, window_params = [{transform_indices = @transform_0, window_bounds = array<i64: 16, 32>}, {pipeline_mode = #tpu.pipeline_mode<synchronous>, transform_indices = @transform_1, window_bounds = array<i64: 32, 96>}, {pipeline_mode = #tpu.pipeline_mode<synchronous>, transform_indices = @transform_2, window_bounds = array<i64: 1, 96>}, {transform_indices = @transform_3, window_bounds = array<i64: 16, 96>}]} {
    %c0 = arith.constant 0 : index
    %c0_0 = arith.constant 0 : index
    %0 = vector.load %arg1[%c0, %c0_0] : memref<16x32xf32, #tpu.memory_space<vmem>>, vector<16x32xf32>
    %c0_1 = arith.constant 0 : index
    %c0_2 = arith.constant 0 : index
    %1 = vector.load %arg2[%c0_1, %c0_2] : memref<32x96xf32, #tpu.memory_space<vmem>>, vector<32x96xf32>
    %cst = arith.constant dense<0.000000e+00> : vector<16x96xf32>
    %2 = tpu.matmul %0, %1, %cst {dimension_numbers = #tpu.dot_dimension_numbers<[1], [0], [0], [1], [0, 0, 1, 1], [], []>} : vector<16x32xf32>, vector<32x96xf32>, vector<16x96xf32> -> vector<16x96xf32>
    %c0_3 = arith.constant 0 : index
    %c0_4 = arith.constant 0 : index
    %3 = vector.load %arg3[%c0_3, %c0_4] : memref<1x96xf32, #tpu.memory_space<vmem>>, vector<1x96xf32>
    %4 = vector.broadcast %3 : vector<1x96xf32> to vector<16x96xf32>
    %5 = arith.addf %2, %4 : vector<16x96xf32>
    %c0_5 = arith.constant 0 : index
    %c0_6 = arith.constant 0 : index
    %6 = vector.load %arg4[%c0_5, %c0_6] : memref<16x96xf32, #tpu.memory_space<vmem>>, vector<16x96xf32>
    tpu.vector_store %arg4[%c0_5, %c0_6], %5 {strides = array<i32>} : memref<16x96xf32, #tpu.memory_space<vmem>>, vector<16x96xf32>,
    return
  }
  func.func @transform_0(%arg0: i32) -> (i32, i32) {
    %c0_i32 = arith.constant 0 : i32
    %c0_i32_0 = arith.constant 0 : i32
    return %arg0, %c0_i32 : i32, i32
  }
  func.func @transform_1(%arg0: i32) -> (i32, i32) {
    %c0_i32 = arith.constant 0 : i32
    %c0_i32_0 = arith.constant 0 : i32
    %c0_i32_1 = arith.constant 0 : i32
    return %c0_i32, %c0_i32_0 : i32, i32
  }
  func.func @transform_2(%arg0: i32) -> (i32, i32) {
    %c0_i32 = arith.constant 0 : i32
    %c0_i32_0 = arith.constant 0 : i32
    %c0_i32_1 = arith.constant 0 : i32
    return %c0_i32, %c0_i32_0 : i32, i32
  }
  func.func @transform_3(%arg0: i32) -> (i32, i32) {
    %c0_i32 = arith.constant 0 : i32
    %c0_i32_0 = arith.constant 0 : i32
    return %arg0, %c0_i32 : i32, i32
  }
}

</mosaic_0001>

<bundles_post_ra>
// kernel: tpu_custom_call.1
= control target key start
LH: loop header
LB: loop body
LE: loop exit
PB: predicated region body
PF: predicated region fallthrough
CT: control target
= control target key end

     0   :  { %8 = vsyncpa [#allocation3], 0  ;;  %s337_s0 = inlined_call_operand.hbm [shape: f32[16,32], index: 0, kind: input, shape index: {}]   ;;  %s338_s1 = inlined_call_operand.hbm [shape: f32[32,96], index: 1, kind: input, shape index: {}]   ;;  %s339_s2 = inlined_call_operand.vmem [shape: f32[1,96], index: 2, kind: input, shape index: {}]   ;;  %s340_s3 = inlined_call_operand.hbm [shape: f32[16,96], index: 3, kind: output, shape index: {}]  }
   0x1   :  { %9 = vsyncpa [#allocation6], 0 }
   0x2   :  { %10 = vsyncpa [#allocation4], 0  ;;  %s264_s12 = smov [#allocation2]   ;;  %s192_s16 = scalar_lea.hbm %s337_s0, 256 }
   0x3   :  { %s16_s13 = sshll.u32 %s264_s12, 4  ;;  %p193_p0 = scmp.ne.s32.totalorder %s337_s0, %s192_s16  ;;  %s17_s13 = int_to_ptr.vmem [resolvable:$true] %s16_s13 }
   0x4   :  { %p196_p1 = scmp.lt.u32.totalorder %s192_s16, %s337_s0 }
   0x6   :  { %p198_p2 = pnand %p196_p1, %p193_p0 }
   0x8   :  { %201 = shalt.err (!%p198_p2)
}
   0x9   :  { %s202_s21 = scalar_lea.vmem %s17_s13, 256  ;;  %p207_p4 = scmp.lt.s32.totalorder %s17_s13, %s17_s13 }
   0xa   :  { %p203_p3 = scmp.ne.s32.totalorder %s17_s13, %s202_s21  ;;  %p208_p5 = scmp.lt.s32.totalorder %s202_s21, %s202_s21 }
   0xc   :  { %p209_p6 = por %p208_p5, %p207_p4 }
   0xe   :  { %p210_p7 = pnand %p209_p6, %p203_p3 }
  0x10   :  { %213 = shalt.err (!%p210_p7)
}
  0x11   :  { %s265_s22 = smov 128   ;;  %s266_s23 = smov 8  }
  0x12   :  { %22 = dma.hbm_to_vmem [thread:$0]  %s337_s0, 256, %s17_s13, [#allocation3], %s265_s22, %s265_s22, %s266_s23  }
  0x13   :  { %s267_s26 = smov [#allocation5]   ;;  %s214_s30 = scalar_lea.hbm %s338_s1, 512 }
  0x14   :  { %s28_s27 = sshll.u32 %s267_s26, 4  ;;  %p215_p8 = scmp.ne.s32.totalorder %s338_s1, %s214_s30  ;;  %s29_s27 = int_to_ptr.vmem [resolvable:$true] %s28_s27 }
  0x15   :  { %p218_p9 = scmp.lt.u32.totalorder %s214_s30, %s338_s1 }
  0x17   :  { %p220_p10 = pnand %p218_p9, %p215_p8 }
  0x19   :  { %223 = shalt.err (!%p220_p10)
}
  0x1a   :  { %s224_s8 = scalar_lea.vmem %s29_s27, 512  ;;  %p229_p12 = scmp.lt.s32.totalorder %s29_s27, %s29_s27 }
  0x1b   :  { %p225_p11 = scmp.ne.s32.totalorder %s29_s27, %s224_s8  ;;  %p230_p13 = scmp.lt.s32.totalorder %s224_s8, %s224_s8 }
  0x1d   :  { %p231_p0 = por %p230_p13, %p229_p12 }
  0x1f   :  { %p232_p1 = pnand %p231_p0, %p225_p11 }
  0x21   :  { %235 = shalt.err (!%p232_p1)
}
  0x22   :  { %34 = dma.hbm_to_vmem [thread:$0]  %s338_s1, 512, %s29_s27, [#allocation6], %s265_s22, %s265_s22, %s266_s23  }
  0x23   :  { %258 = dma.done.wait [#allocation3], 256  }
  0x24   :  { %259 = vsyncadd [#allocation3], 4294967040 }
  0x25   :  { %260 = dma.done.wait [#allocation6], 512  }
  0x26   :  { %261 = vsyncadd [#allocation6], 4294966784  ;;  %vm56_vm0 = vcmask 261120   ;;  %v45_v0 = vld [vmem:[#allocation5] sm:$0xff]  ;;  %v46_v1 = vld [vmem:[#allocation5 + $0x8] sm:$0xff]  ;;  %s268_s11 = smov [#allocation7]  }
  0x27   :  { %v47_v2 = vld [vmem:[#allocation5 + $0x10] sm:$0xff]  ;;  %v179_v3 = vpack.c.bf16 %v46_v1, %v45_v0  ;;  %v48_v4 = vld [vmem:[#allocation5 + $0x18] sm:$0xff]  ;;  %s146_s12 = sshll.u32 %s268_s11, 4  ;;  %vm138_vm1 = vcmask 785408   ;;  %s147_s12 = int_to_ptr.vmem [resolvable:$true] %s146_s12 }
  0x28   :  { %v43_v5 = vld [vmem:[#allocation2] sm:$0xff]  ;;  %v183_v6 = vpack.c.bf16 %v48_v4, %v47_v2  ;;  %v44_v7 = vld [vmem:[#allocation2 + $0x8] sm:$0xff]  ;;  %s236_s13 = scalar_lea.vmem %s147_s12, 256  ;;  %p241_p3 = scmp.lt.s32.totalorder %s147_s12, %s147_s12 }
  0x29   :  { %176 = vmatprep.mubr.msk.f32.mxu0 %vm56_vm0, %v43_v5  ;;  %180 = vmatprep.subr.bf16.mxu0 %v179_v3  ;;  %v159_v8 = vld [vmem:[%s339_s2] ss:$0 sm:$0xff]  ;;  %p237_p2 = scmp.ne.s32.totalorder %s147_s12, %s236_s13  ;;  %p242_p4 = scmp.lt.s32.totalorder %s236_s13, %s236_s13 }
  0x2a   :  { %182 = vmatpush3.bf16.msra.mxu0 %v179_v3 }
  0x2b   :  { %184 = vmatprep.subr.bf16.mxu0 %v183_v6  ;;  %p243_p5 = por %p242_p4, %p241_p3 }
  0x2d   :  { %p244_p6 = pnand %p243_p5, %p237_p2 }
  0x2e   :  { %186 = vmatpush3.bf16.msra.mxu0 %v183_v6 }
  0x31   :  { %177 = vmatmul.mubr.msk.f32.vlgmr.msra.gmra.mrb[0].mxu0 %vm56_vm0, %v44_v7 }
 0x104   :  { %v178_v9 = vpop.f32.mrb[0].mxu0 }
 0x105   :  { %v135_v10 = vadd.f32 %v178_v9, %v159_v8  ;;  %v129_v11 = vpop.f32.mrb[1].mxu0 }
 0x106   :  { %v130_v12 = vadd.f32 %v159_v8, %v129_v11 }
 0x107   :  { %140 = vst.msk [vmem:[#allocation7 + $0x8] sm:$0xff] %vm138_vm1, %v135_v10 }
 0x108   :  { %139 = vst.msk [vmem:[#allocation7] sm:$0xff] %vm138_vm1, %v130_v12 }
 0x109   :  { %247 = shalt.err (!%p244_p6)
}
 0x10a   :  { %s248_s2 = scalar_lea.hbm %s340_s3, 256 }
 0x10b   :  { %p249_p7 = scmp.ne.s32.totalorder %s340_s3, %s248_s2  ;;  %p252_p8 = scmp.lt.u32.totalorder %s248_s2, %s340_s3 }
 0x10d   :  { %p254_p9 = pnand %p252_p8, %p249_p7 }
 0x10f   :  { %257 = shalt.err (!%p254_p9)
}
 0x110   :  { %152 = dma.vmem_to_hbm [thread:$0]  %s147_s12, 256, %s340_s3, [#allocation4], %s265_s22, %s265_s22, %s266_s23  }
 0x111   :  { %262 = dma.done.wait [#allocation4], 256  }
 0x112   :  { %263 = vsyncadd [#allocation4], 4294967040 }
 0x113   :  { %156 = vsyncpa [#allocation3], 1 }
 0x114   :  { %157 = vsyncpa [#allocation6], 1 }
 0x115   :  { %158 = vsyncpa [#allocation4], 1 }

</bundles_post_ra>
